<compile_context>
chip_gen: v7x
topology: tpu7x:2x2x1
jax: 0.10.0
libtpu: 0.0.40
codegen_flags: <defaults>
</compile_context>

<pallas_src>
import functools

import jax
import jax.numpy as jnp
import numpy as np
from jax import lax
from jax.experimental import pallas as pl
from jax.experimental.pallas import tpu as pltpu


def _prelu_ln_kernel(alpha_ref, x_ref, gamma_ref, beta_ref, o_ref, *, eps, inv_n):
    """Process one (E, tT, F) slab of a single (batch, head); stats over (E, F) per t."""
    h = pl.program_id(1)
    a = alpha_ref[h]                              # per-head PReLU slope (SMEM scalar)

    x = x_ref[0, 0].astype(jnp.float32)           # (E, tT, F), compute in f32
    x = jnp.where(x >= 0, x, a * x)               # PReLU

    # One-pass statistics over (E, F): sum and sum-of-squares, then
    # var = E[x^2] - mu^2 (population variance, clamped for numerical safety).
    s = jnp.sum(x, axis=(0, 2), keepdims=True)        # (1, tT, 1)
    ss = jnp.sum(x * x, axis=(0, 2), keepdims=True)   # (1, tT, 1)
    mu = s * inv_n
    var = jnp.maximum(ss * inv_n - mu * mu, 0.0)
    inv_std = lax.rsqrt(var + eps)                    # EUP rsqrt

    g = gamma_ref[0]                               # (E, 1, F)
    b = beta_ref[0]                                # (E, 1, F)
    o_ref[0, 0] = ((x - mu) * inv_std * g + b).astype(o_ref.dtype)


def _pick_time_tile(T, row_bytes, target_bytes=2 << 20):
    """Largest T tile (multiple of 8, or full T) whose block stays <= target_bytes."""
    if T * row_bytes <= target_bytes or T <= 8:
        return T
    tt = (target_bytes // row_bytes) // 8 * 8
    return int(max(8, min(tt, T)))


def all_head_prelu_layernorm(x, gamma, beta, alpha, *, H, E, n_freqs, eps=1e-5,
                             time_tile=None):
    """x: [B, H*E, T, n_freqs]. Returns [B, H, E, T, n_freqs] (same dtype as x)."""
    B, C, T, F = x.shape
    assert C == H * E and F == n_freqs

    # Pure views / tiny params -- no HBM transposes, no forced f32 cast of x.
    x5 = x.reshape(B, H, E, T, F)
    gk = gamma.reshape(H, E, 1, F).astype(jnp.float32)
    bk = beta.reshape(H, E, 1, F).astype(jnp.float32)
    ak = alpha.reshape(H).astype(jnp.float32)

    row_bytes = E * F * jnp.dtype(x.dtype).itemsize
    tT = int(time_tile) if time_tile is not None else _pick_time_tile(T, row_bytes)
    nT = pl.cdiv(T, tT)

    out = pl.pallas_call(
        functools.partial(_prelu_ln_kernel, eps=float(eps), inv_n=1.0 / (E * F)),
        out_shape=jax.ShapeDtypeStruct((B, H, E, T, F), x.dtype),
        grid=(B, H, nT),
        in_specs=[
            pl.BlockSpec(memory_space=pltpu.MemorySpace.SMEM),                # alpha [H]
            pl.BlockSpec((1, 1, E, tT, F), lambda b, h, t: (b, h, 0, t, 0)),  # x slab
            pl.BlockSpec((1, E, 1, F), lambda b, h, t: (h, 0, 0, 0)),         # gamma head
            pl.BlockSpec((1, E, 1, F), lambda b, h, t: (h, 0, 0, 0)),         # beta head
        ],
        out_specs=pl.BlockSpec((1, 1, E, tT, F), lambda b, h, t: (b, h, 0, t, 0)),
        compiler_params=pltpu.CompilerParams(
            dimension_semantics=("parallel", "parallel", "parallel"),
            # blocks capped ~2 MiB -> double-buffered in+out ~8 MiB; well within
            # v5e/v6e (128 MiB physical) and v7x (64 MiB physical) VMEM budgets.
            vmem_limit_bytes=32 * 1024 * 1024),
    )(ak, x5, gk, bk)
    return out


def _reference(x, gamma, beta, alpha, *, H, E, n_freqs, eps=1e-5):
    B, C, T, F = x.shape
    x5 = x.reshape(B, H, E, T, F).astype(jnp.float32)
    a = alpha.reshape(1, H, 1, 1, 1)
    x5 = jnp.where(x5 >= 0, x5, a * x5)
    mu = jnp.mean(x5, axis=(2, 4), keepdims=True)
    var = jnp.mean((x5 - mu) ** 2, axis=(2, 4), keepdims=True)
    std = jnp.sqrt(var + eps)
    return (x5 - mu) / std * gamma + beta


if __name__ == "__main__":
    # Module config: input_dimension = (H, E, n_freqs)
    H, E, n_freqs = 4, 2, 16
    B, T = 2, 8

    key = jax.random.PRNGKey(0)
    kx, kg, kb, k2 = jax.random.split(key, 4)

    # Input: PyTorch NCHW [B, H*E, T, n_freqs]
    x = jax.random.normal(kx, (B, H * E, T, n_freqs), dtype=jnp.float32)

    # Parameters (shapes per __init__; perturbed so the affine path is exercised).
    gamma = jnp.ones((1, H, E, 1, n_freqs), jnp.float32) + \
        0.1 * jax.random.normal(kg, (1, H, E, 1, n_freqs), dtype=jnp.float32)
    beta = 0.1 * jax.random.normal(kb, (1, H, E, 1, n_freqs), dtype=jnp.float32)
    alpha = jnp.full((H,), 0.25, jnp.float32)            # PReLU(num_parameters=H)

    # 1) f32, single time tile.
    out = all_head_prelu_layernorm(x, gamma, beta, alpha,
                                   H=H, E=E, n_freqs=n_freqs, eps=1e-5)
    out = jax.block_until_ready(out)
    ref = _reference(x, gamma, beta, alpha, H=H, E=E, n_freqs=n_freqs, eps=1e-5)
    np.testing.assert_allclose(np.asarray(out), np.asarray(ref), rtol=2e-5, atol=2e-5)

    # 2) Longer sequence with an explicit T tile (exercises the tiled grid).
    T2 = 32
    x2 = jax.random.normal(k2, (B, H * E, T2, n_freqs), dtype=jnp.float32)
    out2 = all_head_prelu_layernorm(x2, gamma, beta, alpha,
                                    H=H, E=E, n_freqs=n_freqs, eps=1e-5, time_tile=8)
    out2 = jax.block_until_ready(out2)
    ref2 = _reference(x2, gamma, beta, alpha, H=H, E=E, n_freqs=n_freqs, eps=1e-5)
    np.testing.assert_allclose(np.asarray(out2), np.asarray(ref2), rtol=2e-5, atol=2e-5)

    # 3) bf16 I/O (dtype-preserving path; statistics still computed in f32).
    xb = x.astype(jnp.bfloat16)
    outb = all_head_prelu_layernorm(xb, gamma, beta, alpha,
                                    H=H, E=E, n_freqs=n_freqs, eps=1e-5)
    outb = jax.block_until_ready(outb)
    refb = _reference(xb.astype(jnp.float32), gamma, beta, alpha,
                      H=H, E=E, n_freqs=n_freqs, eps=1e-5)
    np.testing.assert_allclose(np.asarray(outb).astype(np.float32), np.asarray(refb),
                               rtol=5e-2, atol=5e-2)

    print("KERNEL_OK")
</pallas_src>

<mosaic_0001>
module attributes {stable_mosaic.version = 11 : i64} {
  func.func @_prelu_ln_kernel(%arg0: i32, %arg1: i32, %arg2: i32, %arg3: memref<4xf32, #tpu.memory_space<smem>>, %arg4: memref<1x1x2x8x16xf32, #tpu.memory_space<vmem>>, %arg5: memref<1x2x1x16xf32, #tpu.memory_space<vmem>>, %arg6: memref<1x2x1x16xf32, #tpu.memory_space<vmem>>, %arg7: memref<1x1x2x8x16xf32, #tpu.memory_space<vmem>>) attributes {dimension_semantics = [#tpu.dimension_semantics<parallel>, #tpu.dimension_semantics<parallel>, #tpu.dimension_semantics<parallel>], iteration_bounds = array<i64: 2, 4, 1>, scalar_prefetch = 0 : i64, scratch_operands = 0 : i64, tpu.core_type = #tpu.core_type<tc>, window_params = [{transform_indices = @transform_0, window_bounds = array<i64: 4>}, {transform_indices = @transform_1, window_bounds = array<i64: 1, 1, 2, 8, 16>}, {transform_indices = @transform_2, window_bounds = array<i64: 1, 2, 1, 16>}, {transform_indices = @transform_3, window_bounds = array<i64: 1, 2, 1, 16>}, {transform_indices = @transform_4, window_bounds = array<i64: 1, 1, 2, 8, 16>}]} {
    %0 = arith.index_cast %arg1 : i32 to index
    %1 = memref.load %arg3[%0] : memref<4xf32, #tpu.memory_space<smem>>
    %c0 = arith.constant 0 : index
    %c0_0 = arith.constant 0 : index
    %c0_1 = arith.constant 0 : index
    %c0_2 = arith.constant 0 : index
    %c0_3 = arith.constant 0 : index
    %2 = vector.load %arg4[%c0, %c0_0, %c0_1, %c0_2, %c0_3] : memref<1x1x2x8x16xf32, #tpu.memory_space<vmem>>, vector<1x1x2x8x16xf32>
    %3 = vector.shape_cast %2 : vector<1x1x2x8x16xf32> to vector<2x8x16xf32>
    %cst = arith.constant 0.000000e+00 : f32
    %4 = vector.broadcast %cst : f32 to vector<2x8x16xf32>
    %5 = arith.cmpf oge, %3, %4 : vector<2x8x16xf32>
    %6 = vector.broadcast %1 : f32 to vector<2x8x16xf32>
    %7 = arith.mulf %6, %3 : vector<2x8x16xf32>
    %8 = arith.select %5, %3, %7 : vector<2x8x16xi1>, vector<2x8x16xf32>
    %cst_4 = arith.constant dense<0.000000e+00> : vector<8xf32>
    %9 = vector.multi_reduction <add>, %8, %cst_4 [0, 2] : vector<2x8x16xf32> to vector<8xf32>
    %10 = vector.shape_cast %9 : vector<8xf32> to vector<1x8x1xf32>
    %11 = arith.mulf %8, %8 : vector<2x8x16xf32>
    %cst_5 = arith.constant dense<0.000000e+00> : vector<8xf32>
    %12 = vector.multi_reduction <add>, %11, %cst_5 [0, 2] : vector<2x8x16xf32> to vector<8xf32>
    %13 = vector.shape_cast %12 : vector<8xf32> to vector<1x8x1xf32>
    %cst_6 = arith.constant 3.125000e-02 : f32
    %14 = vector.broadcast %cst_6 : f32 to vector<1x8x1xf32>
    %15 = arith.mulf %10, %14 : vector<1x8x1xf32>
    %cst_7 = arith.constant 3.125000e-02 : f32
    %16 = vector.broadcast %cst_7 : f32 to vector<1x8x1xf32>
    %17 = arith.mulf %13, %16 : vector<1x8x1xf32>
    %18 = arith.mulf %15, %15 : vector<1x8x1xf32>
    %19 = arith.subf %17, %18 : vector<1x8x1xf32>
    %cst_8 = arith.constant 0.000000e+00 : f32
    %20 = vector.broadcast %cst_8 : f32 to vector<1x8x1xf32>
    %21 = arith.maximumf %19, %20 : vector<1x8x1xf32>
    %cst_9 = arith.constant 9.99999974E-6 : f32
    %22 = vector.broadcast %cst_9 : f32 to vector<1x8x1xf32>
    %23 = arith.addf %21, %22 : vector<1x8x1xf32>
    %24 = math.rsqrt %23 : vector<1x8x1xf32>
    %c0_10 = arith.constant 0 : index
    %c0_11 = arith.constant 0 : index
    %c0_12 = arith.constant 0 : index
    %c0_13 = arith.constant 0 : index
    %25 = vector.load %arg5[%c0_10, %c0_11, %c0_12, %c0_13] : memref<1x2x1x16xf32, #tpu.memory_space<vmem>>, vector<1x2x1x16xf32>
    %26 = vector.shape_cast %25 : vector<1x2x1x16xf32> to vector<2x1x16xf32>
    %c0_14 = arith.constant 0 : index
    %c0_15 = arith.constant 0 : index
    %c0_16 = arith.constant 0 : index
    %c0_17 = arith.constant 0 : index
    %27 = vector.load %arg6[%c0_14, %c0_15, %c0_16, %c0_17] : memref<1x2x1x16xf32, #tpu.memory_space<vmem>>, vector<1x2x1x16xf32>
    %28 = vector.shape_cast %27 : vector<1x2x1x16xf32> to vector<2x1x16xf32>
    %29 = vector.broadcast %15 : vector<1x8x1xf32> to vector<2x8x16xf32>
    %30 = arith.subf %8, %29 : vector<2x8x16xf32>
    %31 = vector.broadcast %24 : vector<1x8x1xf32> to vector<2x8x16xf32>
    %32 = arith.mulf %30, %31 : vector<2x8x16xf32>
    %33 = vector.broadcast %26 : vector<2x1x16xf32> to vector<2x8x16xf32>
    %34 = arith.mulf %32, %33 : vector<2x8x16xf32>
    %35 = vector.broadcast %28 : vector<2x1x16xf32> to vector<2x8x16xf32>
    %36 = arith.addf %34, %35 : vector<2x8x16xf32>
    %c0_18 = arith.constant 0 : index
    %c0_19 = arith.constant 0 : index
    %c0_20 = arith.constant 0 : index
    %c0_21 = arith.constant 0 : index
    %c0_22 = arith.constant 0 : index
    %37 = vector.load %arg7[%c0_18, %c0_19, %c0_20, %c0_21, %c0_22] : memref<1x1x2x8x16xf32, #tpu.memory_space<vmem>>, vector<1x1x2x8x16xf32>
    %38 = vector.shape_cast %37 : vector<1x1x2x8x16xf32> to vector<2x8x16xf32>
    %39 = vector.shape_cast %36 : vector<2x8x16xf32> to vector<1x1x2x8x16xf32>
    tpu.vector_store %arg7[%c0_18, %c0_19, %c0_20, %c0_21, %c0_22], %39 {strides = array<i32>} : memref<1x1x2x8x16xf32, #tpu.memory_space<vmem>>, vector<1x1x2x8x16xf32>,
    return
  }
  func.func @transform_0(%arg0: i32, %arg1: i32, %arg2: i32) -> i32 {
    %c0_i32 = arith.constant 0 : i32
    %c0_i32_0 = arith.constant 0 : i32
    return %c0_i32 : i32
  }
  func.func @transform_1(%arg0: i32, %arg1: i32, %arg2: i32) -> (i32, i32, i32, i32, i32) {
    %c0_i32 = arith.constant 0 : i32
    %c0_i32_0 = arith.constant 0 : i32
    %c0_i32_1 = arith.constant 0 : i32
    return %arg0, %arg1, %c0_i32, %arg2, %c0_i32_0 : i32, i32, i32, i32, i32
  }
  func.func @transform_2(%arg0: i32, %arg1: i32, %arg2: i32) -> (i32, i32, i32, i32) {
    %c0_i32 = arith.constant 0 : i32
    %c0_i32_0 = arith.constant 0 : i32
    %c0_i32_1 = arith.constant 0 : i32
    %c0_i32_2 = arith.constant 0 : i32
    return %arg1, %c0_i32, %c0_i32_0, %c0_i32_1 : i32, i32, i32, i32
  }
  func.func @transform_3(%arg0: i32, %arg1: i32, %arg2: i32) -> (i32, i32, i32, i32) {
    %c0_i32 = arith.constant 0 : i32
    %c0_i32_0 = arith.constant 0 : i32
    %c0_i32_1 = arith.constant 0 : i32
    %c0_i32_2 = arith.constant 0 : i32
    return %arg1, %c0_i32, %c0_i32_0, %c0_i32_1 : i32, i32, i32, i32
  }
  func.func @transform_4(%arg0: i32, %arg1: i32, %arg2: i32) -> (i32, i32, i32, i32, i32) {
    %c0_i32 = arith.constant 0 : i32
    %c0_i32_0 = arith.constant 0 : i32
    %c0_i32_1 = arith.constant 0 : i32
    return %arg0, %arg1, %c0_i32, %arg2, %c0_i32_0 : i32, i32, i32, i32, i32
  }
}

</mosaic_0001>

<bundles_post_ra>
// kernel: tpu_custom_call.1
= control target key start
LH: loop header
LB: loop body
LE: loop exit
PB: predicated region body
PF: predicated region fallthrough
CT: control target
= control target key end

     0   :  { %s1300_s0 = inlined_call_operand.hbm [shape: f32[4], index: 0, kind: input, shape index: {}]   ;;  %s1301_s1 = inlined_call_operand.hbm [shape: f32[2,4,2,8,16], index: 1, kind: input, shape index: {}]   ;;  %s1302_s2 = inlined_call_operand.hbm [shape: f32[4,2,1,16], index: 2, kind: input, shape index: {}]   ;;  %s1303_s3 = inlined_call_operand.vmem [shape: f32[4,2,1,16], index: 3, kind: input, shape index: {}]   ;;  %s1304_s4 = inlined_call_operand.hbm [shape: f32[2,4,2,8,16], index: 4, kind: output, shape index: {}]  }
   0x1   :  { %1319 = sst [smem:[#allocation20_spill]] %s1300_s0 }
   0x2   :  { %1320 = sst [smem:[#allocation21_spill]] %s1303_s3 }
   0x3   :  { %1321 = sst [smem:[#allocation22_spill]] %s1304_s4 }
   0x4   :  { %9 = vsyncpa [#allocation5], 0 }
   0x5   :  { %10 = vsyncpa [#allocation3], 0 }
   0x6   :  { %12 = vsyncpa [#allocation3 + $0x1], 0 }
   0x7   :  { %13 = vsyncpa [#allocation8], 0 }
   0x8   :  { %15 = vsyncpa [#allocation8 + $0x1], 0 }
   0x9   :  { %16 = vsyncpa [#allocation4], 0 }
   0xa   :  { %18 = vsyncpa [#allocation4 + $0x1], 0  ;;  %s937_s15 = smov 0   ;;  %s939_s16 = smov 0  }
   0xb   :  { %s941_s17 = smov 0   ;;  %s943_s18 = smov 0  }
   0xc   :  { %s945_s19 = smov 0   ;;  %s947_s20 = smov 0  }
   0xd   :  { %s949_s21 = smov 0   ;;  %s951_s22 = smov 0  }
   0xe   :  { %s953_s23 = smov 0   ;;  %s955_s24 = smov 0  }
   0xf   :  { %s957_s25 = smov 0  }
  0x10 LB: > { %1322 = sst [smem:[#allocation14_spill]] %s872_s18  ;;  %s542_s26 = sadd.s32 4294967295, %s900_s25   ;;  %s900_s25 = sphi %s957_s25, %s24_s25   ;;  %s896_s24 = sphi %s955_s24, %s1366_s24   ;;  %s892_s23 = sphi %s953_s23, %s1365_s23   ;;  %s888_s22 = sphi %s951_s22, %s1364_s22   ;;  %s884_s21 = sphi %s949_s21, %s1363_s21   ;;  %s880_s20 = sphi %s947_s20, %s1362_s20   ;;  %s876_s19 = sphi %s945_s19, %s1361_s19   ;;  %s872_s18 = sphi %s943_s18, %s1360_s18   ;;  %s868_s17 = sphi %s941_s17, %s1359_s17   ;;  %s864_s16 = sphi %s939_s16, %s1358_s16   ;;  %s860_s15 = sphi %s937_s15, %s1357_s15  }
  0x11   : > { %1323 = sst [smem:[#allocation15_spill]] %s884_s21  ;;  %s543_s27 = sadd.s32 4294967294, %s900_s25  }
  0x12   : > { %1324 = sst [smem:[#allocation16_spill]] %s888_s22  ;;  %p82_p0 = scmp.ne.s32.totalorder %s880_s20, %s876_s19 }
  0x13   : > { %p1305_p1 = scmp.eq.s32.totalorder %s900_s25, 0  ;;  %p88_p2 = scmp.ne.s32.totalorder %s876_s19, %s872_s18 }
  0x14   : > { %p998_p3 = scmp.eq.s32.totalorder %s542_s26, 0  ;;  %p114_p4 = scmp.ne.s32.totalorder %s864_s16, %s860_s15 }
  0x15   : > { %p1005_p5 = por %p1305_p1, %p82_p0  ;;  %p168_p6 = scmp.eq.s32.totalorder %s542_s26, 7 }
  0x16   : > { %s1325_s29 = scalar_select %p998_p3, 1, 0 }
  0x17   : > { %p1011_p7 = por %p998_p3, %p88_p2  ;;  %p1017_p8 = por %p114_p4, %p998_p3 }
  0x18   : > { %p1021_p9 = por %p168_p6, %p82_p0  ;;  %p174_p10 = scmp.eq.s32.totalorder %s543_s27, 7 }
  0x19   : > { %s1327_s5 = scalar_select %p1011_p7, 1, 0 }
  0x1a   : > { %s1328_s6 = scalar_select %p1017_p8, 1, 0 }
  0x1b   : > { %s1329_s7 = scalar_select %p1021_p9, 1, 0 }
  0x1c   : > { %p544_p11 = scmp.ge.s32.totalorder %s900_s25, 1  ;;  %p181_p12 = scmp.lt.s32.totalorder %s900_s25, 9 }
  0x1d   : > { %1330 = sst [smem:[#allocation17_spill]] %s1329_s7  ;;  %p1027_p13 = por %p174_p10, %p88_p2 }
  0x1e   : > { %p1031_p1 = pnand %p544_p11, %p181_p12  ;;  %s39_s11 = sadd.s32 1, %s892_s23 }
  0x1f   : > { %s1331_s8 = scalar_select %p1027_p13, 1, 0 }
  0x20   : > { %p581_p4 = pneg %p1031_p1  ;;  %p1044_p0 = scmp.ge.s32.totalorder %s39_s11, 4 }
  0x21   : > { %1332 = sst [smem:[#allocation18_spill]] %s1331_s8  ;;  %s43_s13 = sadd.s32 1, %s896_s24 }
  0x22   : > { %p1039_p8 = pnand %p581_p4, %p998_p3  ;;  %p1314_p2 = scmp.lt.s32.totalorder %s900_s25, 8 }
  0x23   : > { %s1336_s0 = sld [smem:[#allocation20_spill]] }
  0x24   : > { %p699_p10 = pneg %p1039_p8 }
  0x29   : > { %s697_s26 = scalar_lea.hbm %s1336_s0, 16 }
  0x2a   : > { %p698_p6 = scmp.ne.s32.totalorder %s1336_s0, %s697_s26  ;;  %p704_p4 = scmp.lt.u32.totalorder %s697_s26, %s1336_s0 }
  0x2c   : > { %p700_p11 = pnand %p699_p10, %p698_p6 }
  0x2e   : > { %p701_p12 = pneg %p700_p11 }
  0x30   : > { %p706_p13 = pnand %p704_p4, %p701_p12 }
  0x32   : > { %709 = shalt.err (!%p706_p13)
}
  0x33   : > { %s902_s4 = smov [#allocation2]   ;;  %s1368_s11 = smov (%p1044_p0, %s39_s11), 0 }
  0x34   : > { %584 = dma.hbm_to_smem (!%p1039_p8), %s1336_s0, 16, %s902_s4, [#allocation5]  }
  0x35   : > { %1337 = sst [smem:[#allocation19_spill]] %s1368_s11  ;;  %s1370_s13 = smov (!%p1044_p0, %s43_s13), %s896_s24 }
  0x36   : > { %s1075_s18 = ssub.s32 %s892_s23, %s1368_s11  ;;  %s203_s28 = sand.u32 1, %s880_s20  }
  0x37   : > { %p45_p13 = scmp.ge.s32.totalorder %s1370_s13, 2  ;;  %s547_s7 = sshll.u32 %s203_s28, 4 }
  0x38   : > { %s548_s4 = sshll.u32 %s892_s23, 1  ;;  %s549_s10 = sshll.u32 %s896_s24, 3 }
  0x39   : > { %s1372_s13 = smov (%p45_p13, %s1370_s13), 0  ;;  %s214_s15 = sadd.s32 %s549_s10, %s548_s4 }
  0x3a   : > { %s68_s8 = ssub.s32 %s896_s24, %s1372_s13  ;;  %s550_s26 = sshll.u32 %s214_s15, 7 }
  0x3b   : > { %s70_s12 = sor.u32 %s1075_s18, %s68_s8  ;;  %s1089_s0 = scalar_lea.hbm %s1301_s1, %s550_s26 }
  0x3c   : > { %p73_p8 = scmp.eq.s32.totalorder %s70_s12, 0  ;;  %s207_s11 = scalar_lea.vmem [#allocation6], %s547_s7 }
  0x3d   : > { %s217_s3 = sshll.u32 %s207_s11, 4  ;;  %s1338_s22 = sadd.s32 1, %s880_s20  ;;  %s1096_s3 = int_to_ptr.vmem [resolvable:$true] %s217_s3 }
  0x3e   : > { %s1094_s21 = scalar_select %p73_p8, %s880_s20, %s1338_s22  }
  0x3f   : > { %p1102_p0 = pnand %p1314_p2, %p1005_p5  ;;  %s1106_s8 = scalar_lea.sflag [#allocation3], %s203_s28 }
  0x40   : > { %s710_s10 = scalar_lea.hbm %s1089_s0, 256  ;;  %s715_s30 = scalar_lea.hbm %s1301_s1, 2048 }
  0x41   : > { %p711_p10 = scmp.ne.s32.totalorder %s1089_s0, %s710_s10  ;;  %p712_p11 = pneg %p1102_p0 }
  0x42   : > { %p716_p5 = scmp.lt.u32.totalorder %s1089_s0, %s1301_s1  ;;  %p717_p13 = scmp.lt.u32.totalorder %s715_s30, %s710_s10 }
  0x43   : > { %p713_p12 = pnand %p712_p11, %p711_p10  ;;  %p719_p2 = scmp.lt.u32.totalorder %s710_s10, %s1089_s0 }
  0x44   : > { %p718_p8 = por %p717_p13, %p716_p5 }
  0x45   : > { %p714_p4 = pneg %p713_p12 }
  0x46   : > { %p720_p6 = por %p719_p2, %p718_p8 }
  0x48   : > { %p721_p9 = pnand %p720_p6, %p714_p4 }
  0x4a   : > { %724 = shalt.err (!%p721_p9)
}
  0x4b   : > { %s725_s28 = scalar_lea.vmem %s1096_s3, 256  ;;  %s903_s15 = smov [#allocation6]  }
  0x4c   : > { %p726_p10 = scmp.ne.s32.totalorder %s1096_s3, %s725_s28  ;;  %s730_s26 = sshll.u32 %s903_s15, 4  ;;  %s731_s26 = int_to_ptr.vmem [resolvable:$false] %s730_s26 }
  0x4d   : > { %s732_s27 = scalar_lea.vmem %s731_s26, 512  ;;  %p733_p3 = scmp.lt.s32.totalorder %s1096_s3, %s731_s26 }
  0x4e   : > { %p728_p12 = pnand %p726_p10, %p712_p11  ;;  %p734_p5 = scmp.lt.s32.totalorder %s732_s27, %s725_s28 }
  0x50   : > { %p729_p7 = pneg %p728_p12  ;;  %p735_p13 = por %p734_p5, %p733_p3 }
  0x52   : > { %p736_p2 = pnand %p735_p13, %p729_p7 }
  0x54   : > { %739 = shalt.err (!%p736_p2)
}
  0x55   : > { %s904_s14 = smov 128   ;;  %s905_s10 = smov 8  }
  0x56   : > { %588 = dma.hbm_to_vmem [thread:$0]  (!%p1102_p0), %s1089_s0, 256, %s1096_s3, %s1106_s8, %s904_s14, %s904_s14, %s905_s10  }
  0x57   : > { %s570_s22 = sshll.u32 %s892_s23, 5  ;;  %s101_s11 = sadd.s32 1, %s868_s17 }
  0x58   : > { %p108_p3 = scmp.ne.s32.totalorder %s868_s17, %s864_s16  ;;  %p1340_p7 = scmp.eq.s32.totalorder %s1075_s18, 0 }
  0x59   : > { %p1341_p9 = scmp.eq.s32.totalorder %s900_s25, 0  ;;  %s227_s7 = sand.u32 1, %s868_s17  }
  0x5a   : > { %s1141_s30 = scalar_select %p1340_p7, %s868_s17, %s101_s11  }
  0x5b   : > { %p110_p6 = por %p108_p3, %p1341_p9  ;;  %s551_s12 = sshll.u32 %s227_s7, 1 }
  0x5c   : > { %s1149_s26 = scalar_lea.hbm %s1302_s2, %s570_s22  ;;  %s231_s0 = scalar_lea.vmem [#allocation7], %s551_s12 }
  0x5d   : > { %s238_s3 = sshll.u32 %s231_s0, 4  ;;  %p1342_p0 = scmp.lt.s32.totalorder %s900_s25, 8  ;;  %s1157_s3 = int_to_ptr.vmem [resolvable:$true] %s238_s3 }
  0x5e   : > { %s1159_s4 = scalar_lea.sflag [#allocation8], %s227_s7  ;;  %s740_s8 = scalar_lea.hbm %s1149_s26, 32 }
  0x5f   : > { %p1153_p11 = pnand %p1342_p0, %p110_p6  ;;  %p741_p4 = scmp.ne.s32.totalorder %s1149_s26, %s740_s8 }
  0x60   : > { %s745_s10 = scalar_lea.hbm %s1302_s2, 128  ;;  %p746_p5 = scmp.lt.u32.totalorder %s1149_s26, %s1302_s2 }
  0x61   : > { %p742_p8 = pneg %p1153_p11  ;;  %p747_p13 = scmp.lt.u32.totalorder %s745_s10, %s740_s8 }
  0x62   : > { %p749_p3 = scmp.lt.u32.totalorder %s740_s8, %s1149_s26 }
  0x63   : > { %p743_p10 = pnand %p742_p8, %p741_p4  ;;  %p748_p2 = por %p747_p13, %p746_p5 }
  0x65   : > { %p744_p12 = pneg %p743_p10  ;;  %p750_p7 = por %p749_p3, %p748_p2 }
  0x67   : > { %p751_p9 = pnand %p750_p7, %p744_p12 }
  0x69   : > { %754 = shalt.err (!%p751_p9)
}
  0x6a   : > { %s755_s7 = scalar_lea.vmem %s1157_s3, 32  ;;  %s906_s12 = smov [#allocation7]  }
  0x6b   : > { %p756_p6 = scmp.ne.s32.totalorder %s1157_s3, %s755_s7  ;;  %s760_s28 = sshll.u32 %s906_s12, 4  ;;  %s761_s28 = int_to_ptr.vmem [resolvable:$false] %s760_s28 }
  0x6c   : > { %s762_s15 = scalar_lea.vmem %s761_s28, 64  ;;  %p763_p10 = scmp.lt.s32.totalorder %s1157_s3, %s761_s28 }
  0x6d   : > { %p758_p0 = pnand %p756_p6, %p742_p8  ;;  %p764_p5 = scmp.lt.s32.totalorder %s762_s15, %s755_s7 }
  0x6f   : > { %p759_p4 = pneg %p758_p0  ;;  %p765_p13 = por %p764_p5, %p763_p10 }
  0x71   : > { %p766_p2 = pnand %p765_p13, %p759_p4 }
  0x73   : > { %769 = shalt.err (!%p766_p2)
}
  0x74   : > { %s907_s0 = smov 16   ;;  %s908_s8 = smov 1  }
  0x75   : > { %591 = dma.hbm_to_vmem [thread:$0]  (!%p1153_p11), %s1149_s26, 32, %s1157_s3, %s1159_s4, %s907_s0, %s907_s0, %s908_s8  }
  0x76   : > { %257 = sbr.rel (%p1031_p1) target bundleno = 341 (0x155), region = 36  ;;  %p1344_p8 = scmp.ne.s32.totalorder (!%p1031_p1), %s1325_s29, 0 }
  0x7d   : > { %843 = dma.done.wait (%p1344_p8), [#allocation5], 16  }
  0x7e   : > { %845 = vsyncadd (%p1344_p8), [#allocation5], 4294967280  ;;  %s1194_s27 = sand.u32 1, %s876_s19   ;;  %p1345_p11 = scmp.ne.s32.totalorder %s1327_s5, 0 }
  0x7f   : > { %s556_s14 = sshll.u32 %s1194_s27, 4  ;;  %s264_s10 = scalar_lea.sflag [#allocation3], %s1194_s27 }
  0x80   : > { %s267_s26 = scalar_lea.vmem [#allocation6], %s556_s14 }
  0x81   : > { %847 = dma.done.wait (%p1345_p11), %s264_s10, 256  }
  0x82   : > { %849 = vsyncadd (%p1345_p11), %s264_s10, 4294967040  ;;  %s272_s29 = sand.u32 1, %s864_s16   ;;  %p1346_p1 = scmp.ne.s32.totalorder %s1328_s6, 0 }
  0x83   : > { %s1205_s9 = sshll.u32 %s272_s29, 1  ;;  %s273_s3 = scalar_lea.sflag [#allocation8], %s272_s29 }
  0x84   : > { %s276_s18 = scalar_lea.vmem [#allocation7], %s1205_s9 }
  0x85   : > { %851 = dma.done.wait (%p1346_p1), %s273_s3, 32  }
  0x86   : > { %853 = vsyncadd (%p1346_p1), %s273_s3, 4294967264 }
  0x87   : > { %281 = sfence }
  0x88   : > { %s1347_s4 = sld [smem:[#allocation15_spill]]  ;;  %v316_v0 = vld [vmem:[%s267_s26] sm:$0xff]  ;;  %v317_v1 = vld [vmem:[%s267_s26 + $0x8] sm:$0xff]  ;;  %vm325_vm2 = vcmask 130048   ;;  %s1348_s5 = sld [smem:[#allocation16_spill]] }
  0x89   : > { %vm318_vm0 = vcmp.ge.f32.partialorder %v316_v0, 0.0  ;;  %vm319_vm1 = vcmp.ge.f32.partialorder %v317_v1, 0.0  ;;  %s1349_s8 = sld [smem:[#allocation21_spill]]  ;;  %v560_v26 = vld [vmem:[%s276_s18] ss:$0 sm:$0xff]  ;;  %s1350_s29 = sld [smem:[#allocation17_spill]] }
  0x8a   : > { %v561_v27 = vld [vmem:[%s276_s18 + $0x1] ss:$0 sm:$0xff]  ;;  %s310_s3 = scalar_lea.vmem [#allocation9], %s556_s14  ;;  %s384_s14 = scalar_lea.sflag [#allocation4], %s1194_s27 }
  0x8b   : > { %s909_s18 = smov [#allocation9]  }
  0x8e   : > { %s315_s22 = sld [smem:[#allocation2 + %s1347_s4]]  ;;  %p311_p12 = scmp.lt.s32.totalorder %s1347_s4, 3 }
  0x8f   : > { %s565_s11 = sshll.u32 %s1347_s4, 1  ;;  %s566_s7 = sshll.u32 %s1348_s5, 3 }
  0x90   : > { %s312_s6 = scalar_select %p311_p12, %s1347_s4, 3 }
  0x91   : > { %s397_s28 = sadd.s32 %s566_s7, %s565_s11  ;;  %s400_s4 = sshll.u32 %s310_s3, 4  ;;  %s1235_s4 = int_to_ptr.vmem [resolvable:$true] %s400_s4 }
  0x92   : > { %s559_s12 = sshll.u32 %s312_s6, 1  ;;  %s567_s26 = sshll.u32 %s397_s28, 7 }
  0x93   : > { %s314_s10 = scalar_lea.vmem %s1349_s8, %s559_s12  ;;  %s1351_s6 = sld [smem:[#allocation22_spill]] }
  0x94   : > { %v320_v2 = vstv %s315_s22  ;;  %v562_v30 = vld [vmem:[%s314_s10] ss:$0 sm:$0xff]  ;;  %v563_v31 = vld [vmem:[%s314_s10 + $0x1] ss:$0 sm:$0xff]  ;;  %s770_s9 = scalar_lea.vmem %s1235_s4, 256  ;;  %p1352_p7 = scmp.ne.s32.totalorder %s1350_s29, 0 }
  0x95   : > { %v321_v3 = vmul.f32 %v320_v2, %v316_v0  ;;  %v322_v4 = vmul.f32 %v320_v2, %v317_v1  ;;  %p771_p3 = scmp.ne.s32.totalorder %s1235_s4, %s770_s9  ;;  %s774_s7 = sshll.u32 %s909_s18, 4  ;;  %s775_s7 = int_to_ptr.vmem [resolvable:$false] %s774_s7 }
  0x96   : > { %s776_s12 = scalar_lea.vmem %s775_s7, 512  ;;  %p777_p0 = scmp.lt.s32.totalorder %s1235_s4, %s775_s7 }
  0x97   : > { %v323_v5 = vsel %vm318_vm0, %v316_v0, %v321_v3  ;;  %v324_v6 = vsel %vm319_vm1, %v317_v1, %v322_v4  ;;  %p772_p9 = pnand %p771_p3, %p1352_p7  ;;  %p778_p4 = scmp.lt.s32.totalorder %s776_s12, %s770_s9 }
  0x98   : > { %v326_v7 = vsel %vm325_vm2, %v323_v5, 0.0  ;;  %v327_v8 = vsel %vm325_vm2, %v324_v6, 0.0  ;;  %v331_v9 = vmul.f32 %v323_v5, %v323_v5  ;;  %v332_v10 = vmul.f32 %v324_v6, %v324_v6 }
  0x99   : > { %v328_v11 = vadd.f32 %v327_v8, %v326_v7  ;;  %s1233_s11 = scalar_lea.hbm %s1351_s6, %s567_s26  ;;  %p773_p6 = pneg %p772_p9 }
  0x9a   : > { %v333_v12 = vsel %vm325_vm2, %v331_v9, 0.0  ;;  %v334_v13 = vsel %vm325_vm2, %v332_v10, 0.0  ;;  %p779_p10 = por %p778_p4, %p777_p0 }
  0x9b   : > { %329 = vadd.xlane.f32.xlu0 %v328_v11  ;;  %v335_v14 = vadd.f32 %v334_v13, %v333_v12 }
  0x9c   : > { %p780_p5 = pnand %p779_p10, %p773_p6 }
  0x9f   : > { %336 = vadd.xlane.f32.xlu0 %v335_v14 }
 0x128   : > { %v330_v15 = vpop.xlane.xlu0 %329 }
 0x129   : > { %v338_v16 = vmul.f32 0.03125, %v330_v15 }
 0x12b   : > { %v340_v18 = vmul.f32 %v338_v16, %v338_v16  ;;  %v349_v23 = vsub.f32 %v323_v5, %v338_v16  ;;  %v350_v24 = vsub.f32 %v324_v6, %v338_v16 }
 0x12c   : > { %v337_v17 = vpop.xlane.xlu0 %336 }
 0x12d   : > { %v339_v19 = vmul.f32 0.03125, %v337_v17 }
 0x12f   : > { %v341_v20 = vsub.f32 %v339_v19, %v340_v18 }
 0x131   : > { %v342_v21 = vmax.f32 %v341_v20, 0.0 }
 0x133   : > { %v343_v22 = vadd.f32 1e-05, %v342_v21 }
 0x135   : > { %695 = vrsqrt.f32 %v343_v22 }
 0x13f   : > { %v696_v25 = vpop.eup %695 }
 0x140   : > { %v351_v28 = vmul.f32 %v696_v25, %v349_v23  ;;  %v352_v29 = vmul.f32 %v696_v25, %v350_v24 }
 0x142   : > { %v365_v32 = vmul.f32 %v560_v26, %v351_v28  ;;  %v366_v33 = vmul.f32 %v561_v27, %v352_v29 }
 0x144   : > { %v379_v34 = vadd.f32 %v562_v30, %v365_v32  ;;  %v380_v35 = vadd.f32 %v563_v31, %v366_v33 }
 0x146   : > { %381 = vst.msk [vmem:[%s310_s3] sm:$0xff] %vm325_vm2, %v379_v34  ;;  %382 = vst.msk [vmem:[%s310_s3 + $0x8] sm:$0xff] %vm325_vm2, %v380_v35 }
 0x147   : > { %783 = shalt.err (!%p780_p5)
}
 0x148   : > { %s784_s28 = scalar_lea.hbm %s1233_s11, 256  ;;  %s788_s8 = scalar_lea.hbm %s1351_s6, 2048 }
 0x149   : > { %p785_p13 = scmp.ne.s32.totalorder %s1233_s11, %s784_s28  ;;  %p789_p11 = scmp.lt.u32.totalorder %s1233_s11, %s1351_s6 }
 0x14a   : > { %p790_p1 = scmp.lt.u32.totalorder %s788_s8, %s784_s28  ;;  %p792_p3 = scmp.lt.u32.totalorder %s784_s28, %s1233_s11 }
 0x14b   : > { %p786_p2 = pnand %p785_p13, %p1352_p7 }
 0x14c   : > { %p791_p12 = por %p790_p1, %p789_p11 }
 0x14d   : > { %p787_p8 = pneg %p786_p2 }
 0x14e   : > { %p793_p9 = por %p792_p3, %p791_p12 }
 0x150   : > { %p794_p6 = pnand %p793_p9, %p787_p8 }
 0x152   : > { %797 = shalt.err (!%p794_p6)
}
 0x153   : > { %s910_s3 = smov 128   ;;  %s911_s22 = smov 8  }
 0x154   : > { %579 = dma.vmem_to_hbm [thread:$0]  (%p1352_p7), %s1235_s4, 256, %s1233_s11, %s384_s14, %s910_s3, %s910_s3, %s911_s22  }
 0x155 PF: > { %s1353_s5 = sld [smem:[#allocation14_spill]]  ;;  %s1354_s9 = sld [smem:[#allocation18_spill]] }
 0x156   : > { %p599_p0 = scmp.ge.s32.totalorder %s900_s25, 2 }
 0x15b   : > { %s415_s18 = sand.u32 1, %s1353_s5   ;;  %p1355_p4 = scmp.ne.s32.totalorder %s1354_s9, 0 }
 0x15c   : > { %s416_s7 = scalar_lea.sflag [#allocation4], %s415_s18 }
 0x15d   : > { %p593_p10 = pnand %p599_p0, %p1355_p4 }
 0x15f   : > { %855 = dma.done.wait (!%p593_p10), %s416_s7, 256  }
 0x160   : > { %857 = vsyncadd (!%p593_p10), %s416_s7, 4294967040  ;;  %s24_s25 = sadd.s32 1, %s900_s25   ;;  %s1356_s27 = sld [smem:[#allocation19_spill]] }
 0x161   : > { %p21_p5 = scmp.ge.s32.totalorder %s24_s25, 10   ;;  %s1357_s15 = smov %s864_s16 }
 0x162   : > { %s1358_s16 = smov %s868_s17  ;;  %s1359_s17 = smov %s1141_s30 }
 0x163   : > { %s1360_s18 = smov %s876_s19  ;;  %s1361_s19 = smov %s880_s20 }
 0x164   : > { %s1362_s20 = smov %s1094_s21  ;;  %s1363_s21 = smov %s892_s23 }
 0x165   : > { %s1364_s22 = smov %s896_s24  ;;  %s1366_s24 = smov %s1372_s13 }
 0x166   : > { %s1365_s23 = smov %s1356_s27  ;;  %23 = sbr.rel (!%p21_p5) target bundleno = 16 (0x10), region = 102 }
 0x16d   :  { %421 = vsyncpa [#allocation3], 1 }
 0x16e   :  { %423 = vsyncpa [#allocation3 + $0x1], 1 }
 0x16f   :  { %424 = vsyncpa [#allocation8], 1 }
 0x170   :  { %426 = vsyncpa [#allocation8 + $0x1], 1 }
 0x171   :  { %427 = vsyncpa [#allocation4], 1 }
 0x172   :  { %429 = vsyncpa [#allocation4 + $0x1], 1 }
 0x173   :  { %430 = vsyncpa [#allocation5], 1 }
 0x174   :  { %432 = vsyncpa [#allocation5 + $0x1], 1 }

</bundles_post_ra>
